<compile_context>
chip_gen: v6e
topology: v6e:2x2x1
jax: 0.10.0
libtpu: 0.0.40
codegen_flags: <defaults>
</compile_context>

<pallas_src>
import functools

import jax
import jax.numpy as jnp
from jax.experimental import pallas as pl
from jax.experimental.pallas import tpu as pltpu

D_IN = 784
H1 = 512
H2 = 256
D_OUT = 10
D_OUT_PAD = 128     # lane-dense output store


def mlp_kernel(x_ref, w1_ref, b1_ref, w2_ref, b2_ref, w3_ref, b3_ref, o_ref):
    # x: [TB, 784] bf16 (streamed); weights bf16 [in, out]; biases f32 [1, out].
    x = x_ref[...]
    h1 = jnp.dot(x, w1_ref[...], preferred_element_type=jnp.float32) + b1_ref[...]
    h1 = jnp.maximum(h1, 0.0)                                   # ReLU (VPU, f32)
    h2 = jnp.dot(h1.astype(jnp.bfloat16), w2_ref[...],
                 preferred_element_type=jnp.float32) + b2_ref[...]
    h2 = jnp.maximum(h2, 0.0)                                   # ReLU (VPU, f32)
    o_ref[...] = (
        jnp.dot(h2.astype(jnp.bfloat16), w3_ref[...],
                preferred_element_type=jnp.float32)
        + b3_ref[...]
    )


def _round_up(x, m):
    return (x + m - 1) // m * m


def _choose_tile(B, tile_cap):
    """Pick TB (multiple of 8, <= tile_cap) so the grid has >= 2 steps when B > 8."""
    if B <= 8:
        return 8
    return min(tile_cap, max(8, _round_up((B + 1) // 2, 8)))


@functools.partial(jax.jit, static_argnames=("tile_b",))
def mlp_forward(x_nchw, padded_params, tile_b=512):
    """x_nchw: [B, 1, 28, 28] float32 -> logits [B, 10]."""
    w1, b1, w2, b2, w3, b3 = padded_params
    B = x_nchw.shape[0]

    # nn.Flatten(): row-major [B, 784]; cast to bf16 in the same wrapper pass
    # (no separate K-pad pass).  Only the batch dim is padded, and only if needed.
    x2d = x_nchw.reshape(B, -1).astype(jnp.bfloat16)
    TB = _choose_tile(B, tile_b)
    B_pad = _round_up(B, TB)
    if B_pad != B:
        x2d = jnp.pad(x2d, ((0, B_pad - B), (0, 0)))
    num_tiles = B_pad // TB

    out = pl.pallas_call(
        mlp_kernel,
        out_shape=jax.ShapeDtypeStruct((B_pad, D_OUT_PAD), jnp.float32),
        grid=(num_tiles,),
        in_specs=[
            pl.BlockSpec((TB, D_IN), lambda i: (i, 0)),         # x tile: streams (bf16)
            pl.BlockSpec((D_IN, H1), lambda i: (0, 0)),         # weights: VMEM-resident
            pl.BlockSpec((1, H1), lambda i: (0, 0)),
            pl.BlockSpec((H1, H2), lambda i: (0, 0)),
            pl.BlockSpec((1, H2), lambda i: (0, 0)),
            pl.BlockSpec((H2, D_OUT_PAD), lambda i: (0, 0)),
            pl.BlockSpec((1, D_OUT_PAD), lambda i: (0, 0)),
        ],
        out_specs=pl.BlockSpec((TB, D_OUT_PAD), lambda i: (i, 0)),
        compiler_params=pltpu.CompilerParams(
            dimension_semantics=("parallel",),      # batch tiles shard across TCs (v7x)
        ),
    )(x2d, w1, b1, w2, b2, w3, b3)

    return out[:B, :D_OUT]


def init_params(key):
    """Deterministic init mimicking PyTorch Linear default (uniform +/- 1/sqrt(fan_in)).

    Weights stored as [in, out] f32 (already transposed for x @ W)."""
    dims = [(D_IN, H1), (H1, H2), (H2, D_OUT)]
    params = []
    for (fan_in, fan_out) in dims:
        key, kw, kb = jax.random.split(key, 3)
        bound = 1.0 / jnp.sqrt(fan_in)
        w = jax.random.uniform(kw, (fan_in, fan_out), jnp.float32, -bound, bound)
        b = jax.random.uniform(kb, (1, fan_out), jnp.float32, -bound, bound)
        params.extend([w, b])
    return tuple(params)


def prepare_params(params_f32):
    """Cast weights to bf16 (biases stay f32); pad only the 10-wide output layer to 128."""
    w1, b1, w2, b2, w3, b3 = params_f32
    w1p = w1.astype(jnp.bfloat16)                               # (784, 512) — no K pad
    w2p = w2.astype(jnp.bfloat16)
    w3p = jnp.pad(w3, ((0, 0), (0, D_OUT_PAD - D_OUT))).astype(jnp.bfloat16)
    b3p = jnp.pad(b3, ((0, 0), (0, D_OUT_PAD - D_OUT)))
    return (w1p, b1, w2p, b2, w3p, b3p)


def reference_forward_f32(x_nchw, params_f32):
    """Pure-JAX f32 reference of the PyTorch forward."""
    w1, b1, w2, b2, w3, b3 = params_f32
    x = x_nchw.reshape(x_nchw.shape[0], -1)
    h1 = jnp.maximum(x @ w1 + b1, 0.0)
    h2 = jnp.maximum(h1 @ w2 + b2, 0.0)
    return h2 @ w3 + b3


def reference_forward_bf16(x_nchw, params_f32):
    """Same forward but with bf16 matmul operands / f32 accumulation (matches kernel)."""
    w1, b1, w2, b2, w3, b3 = params_f32
    bf = jnp.bfloat16
    x = x_nchw.reshape(x_nchw.shape[0], -1)
    h1 = jnp.maximum(
        jnp.dot(x.astype(bf), w1.astype(bf), preferred_element_type=jnp.float32) + b1, 0.0)
    h2 = jnp.maximum(
        jnp.dot(h1.astype(bf), w2.astype(bf), preferred_element_type=jnp.float32) + b2, 0.0)
    return jnp.dot(h2.astype(bf), w3.astype(bf), preferred_element_type=jnp.float32) + b3


if __name__ == "__main__":
    key = jax.random.PRNGKey(0)
    params_f32 = init_params(key)
    params = prepare_params(params_f32)

    # Small MNIST-like batch: [B, 1, 28, 28] (flatten -> 784, matching Linear(784, ...))
    key, kx = jax.random.split(key)
    B = 2
    x = jax.random.normal(kx, (B, 1, 28, 28), jnp.float32)

    out = mlp_forward(x, params)
    out = jax.block_until_ready(out)
    assert out.shape == (B, D_OUT)

    # Tight check vs a reference using the same bf16-operand / f32-accum matmuls.
    ref_bf16 = reference_forward_bf16(x, params_f32)
    assert jnp.allclose(out, ref_bf16, atol=2e-3, rtol=2e-3), "mismatch vs bf16 reference"

    # Loose check vs exact PyTorch-semantics f32 forward (bf16 weight rounding only).
    ref_f32 = reference_forward_f32(x, params_f32)
    assert jnp.allclose(out, ref_f32, atol=3e-2, rtol=3e-2), "mismatch vs f32 reference"

    # Multi-tile path (exercises >=2 grid steps, ragged batch pad).
    key, kx2 = jax.random.split(key)
    B2 = 40
    x2 = jax.random.normal(kx2, (B2, 1, 28, 28), jnp.float32)
    out2 = jax.block_until_ready(mlp_forward(x2, params))
    ref2 = reference_forward_bf16(x2, params_f32)
    assert out2.shape == (B2, D_OUT)
    assert jnp.allclose(out2, ref2, atol=2e-3, rtol=2e-3), "mismatch on multi-tile batch"

    print("KERNEL_OK")
</pallas_src>

<mosaic_0001>
module attributes {stable_mosaic.version = 11 : i64} {
  func.func @mlp_kernel(%arg0: i32, %arg1: memref<8x784xbf16, #tpu.memory_space<vmem>>, %arg2: memref<784x512xbf16, #tpu.memory_space<vmem>>, %arg3: memref<1x512xf32, #tpu.memory_space<vmem>>, %arg4: memref<512x256xbf16, #tpu.memory_space<vmem>>, %arg5: memref<1x256xf32, #tpu.memory_space<vmem>>, %arg6: memref<256x128xbf16, #tpu.memory_space<vmem>>, %arg7: memref<1x128xf32, #tpu.memory_space<vmem>>, %arg8: memref<8x128xf32, #tpu.memory_space<vmem>>) attributes {dimension_semantics = [#tpu.dimension_semantics<parallel>], iteration_bounds = array<i64: 1>, scalar_prefetch = 0 : i64, scratch_operands = 0 : i64, tpu.core_type = #tpu.core_type<tc>, window_params = [{transform_indices = @transform_0, window_bounds = array<i64: 8, 784>}, {pipeline_mode = #tpu.pipeline_mode<synchronous>, transform_indices = @transform_1, window_bounds = array<i64: 784, 512>}, {pipeline_mode = #tpu.pipeline_mode<synchronous>, transform_indices = @transform_2, window_bounds = array<i64: 1, 512>}, {pipeline_mode = #tpu.pipeline_mode<synchronous>, transform_indices = @transform_3, window_bounds = array<i64: 512, 256>}, {pipeline_mode = #tpu.pipeline_mode<synchronous>, transform_indices = @transform_4, window_bounds = array<i64: 1, 256>}, {pipeline_mode = #tpu.pipeline_mode<synchronous>, transform_indices = @transform_5, window_bounds = array<i64: 256, 128>}, {pipeline_mode = #tpu.pipeline_mode<synchronous>, transform_indices = @transform_6, window_bounds = array<i64: 1, 128>}, {transform_indices = @transform_7, window_bounds = array<i64: 8, 128>}]} {
    %c0 = arith.constant 0 : index
    %c0_0 = arith.constant 0 : index
    %0 = vector.load %arg1[%c0, %c0_0] : memref<8x784xbf16, #tpu.memory_space<vmem>>, vector<8x784xbf16>
    %c0_1 = arith.constant 0 : index
    %c0_2 = arith.constant 0 : index
    %1 = vector.load %arg2[%c0_1, %c0_2] : memref<784x512xbf16, #tpu.memory_space<vmem>>, vector<784x512xbf16>
    %cst = arith.constant dense<0.000000e+00> : vector<8x512xf32>
    %2 = tpu.matmul %0, %1, %cst {dimension_numbers = #tpu.dot_dimension_numbers<[1], [0], [0], [1], [0, 0, 1, 1], [], []>} : vector<8x784xbf16>, vector<784x512xbf16>, vector<8x512xf32> -> vector<8x512xf32>
    %c0_3 = arith.constant 0 : index
    %c0_4 = arith.constant 0 : index
    %3 = vector.load %arg3[%c0_3, %c0_4] : memref<1x512xf32, #tpu.memory_space<vmem>>, vector<1x512xf32>
    %4 = vector.broadcast %3 : vector<1x512xf32> to vector<8x512xf32>
    %5 = arith.addf %2, %4 : vector<8x512xf32>
    %cst_5 = arith.constant 0.000000e+00 : f32
    %6 = vector.broadcast %cst_5 : f32 to vector<8x512xf32>
    %7 = arith.maximumf %5, %6 : vector<8x512xf32>
    %8 = arith.truncf %7 : vector<8x512xf32> to vector<8x512xbf16>
    %c0_6 = arith.constant 0 : index
    %c0_7 = arith.constant 0 : index
    %9 = vector.load %arg4[%c0_6, %c0_7] : memref<512x256xbf16, #tpu.memory_space<vmem>>, vector<512x256xbf16>
    %cst_8 = arith.constant dense<0.000000e+00> : vector<8x256xf32>
    %10 = tpu.matmul %8, %9, %cst_8 {dimension_numbers = #tpu.dot_dimension_numbers<[1], [0], [0], [1], [0, 0, 1, 1], [], []>} : vector<8x512xbf16>, vector<512x256xbf16>, vector<8x256xf32> -> vector<8x256xf32>
    %c0_9 = arith.constant 0 : index
    %c0_10 = arith.constant 0 : index
    %11 = vector.load %arg5[%c0_9, %c0_10] : memref<1x256xf32, #tpu.memory_space<vmem>>, vector<1x256xf32>
    %12 = vector.broadcast %11 : vector<1x256xf32> to vector<8x256xf32>
    %13 = arith.addf %10, %12 : vector<8x256xf32>
    %cst_11 = arith.constant 0.000000e+00 : f32
    %14 = vector.broadcast %cst_11 : f32 to vector<8x256xf32>
    %15 = arith.maximumf %13, %14 : vector<8x256xf32>
    %16 = arith.truncf %15 : vector<8x256xf32> to vector<8x256xbf16>
    %c0_12 = arith.constant 0 : index
    %c0_13 = arith.constant 0 : index
    %17 = vector.load %arg6[%c0_12, %c0_13] : memref<256x128xbf16, #tpu.memory_space<vmem>>, vector<256x128xbf16>
    %cst_14 = arith.constant dense<0.000000e+00> : vector<8x128xf32>
    %18 = tpu.matmul %16, %17, %cst_14 {dimension_numbers = #tpu.dot_dimension_numbers<[1], [0], [0], [1], [0, 0, 1, 1], [], []>} : vector<8x256xbf16>, vector<256x128xbf16>, vector<8x128xf32> -> vector<8x128xf32>
    %c0_15 = arith.constant 0 : index
    %c0_16 = arith.constant 0 : index
    %19 = vector.load %arg7[%c0_15, %c0_16] : memref<1x128xf32, #tpu.memory_space<vmem>>, vector<1x128xf32>
    %20 = vector.broadcast %19 : vector<1x128xf32> to vector<8x128xf32>
    %21 = arith.addf %18, %20 : vector<8x128xf32>
    %c0_17 = arith.constant 0 : index
    %c0_18 = arith.constant 0 : index
    %22 = vector.load %arg8[%c0_17, %c0_18] : memref<8x128xf32, #tpu.memory_space<vmem>>, vector<8x128xf32>
    tpu.vector_store %arg8[%c0_17, %c0_18], %21 {strides = array<i32>} : memref<8x128xf32, #tpu.memory_space<vmem>>, vector<8x128xf32>,
    return
  }
  func.func @transform_0(%arg0: i32) -> (i32, i32) {
    %c0_i32 = arith.constant 0 : i32
    %c0_i32_0 = arith.constant 0 : i32
    return %arg0, %c0_i32 : i32, i32
  }
  func.func @transform_1(%arg0: i32) -> (i32, i32) {
    %c0_i32 = arith.constant 0 : i32
    %c0_i32_0 = arith.constant 0 : i32
    %c0_i32_1 = arith.constant 0 : i32
    return %c0_i32, %c0_i32_0 : i32, i32
  }
  func.func @transform_2(%arg0: i32) -> (i32, i32) {
    %c0_i32 = arith.constant 0 : i32
    %c0_i32_0 = arith.constant 0 : i32
    %c0_i32_1 = arith.constant 0 : i32
    return %c0_i32, %c0_i32_0 : i32, i32
  }
  func.func @transform_3(%arg0: i32) -> (i32, i32) {
    %c0_i32 = arith.constant 0 : i32
    %c0_i32_0 = arith.constant 0 : i32
    %c0_i32_1 = arith.constant 0 : i32
    return %c0_i32, %c0_i32_0 : i32, i32
  }
  func.func @transform_4(%arg0: i32) -> (i32, i32) {
    %c0_i32 = arith.constant 0 : i32
    %c0_i32_0 = arith.constant 0 : i32
    %c0_i32_1 = arith.constant 0 : i32
    return %c0_i32, %c0_i32_0 : i32, i32
  }
  func.func @transform_5(%arg0: i32) -> (i32, i32) {
    %c0_i32 = arith.constant 0 : i32
    %c0_i32_0 = arith.constant 0 : i32
    %c0_i32_1 = arith.constant 0 : i32
    return %c0_i32, %c0_i32_0 : i32, i32
  }
  func.func @transform_6(%arg0: i32) -> (i32, i32) {
    %c0_i32 = arith.constant 0 : i32
    %c0_i32_0 = arith.constant 0 : i32
    %c0_i32_1 = arith.constant 0 : i32
    return %c0_i32, %c0_i32_0 : i32, i32
  }
  func.func @transform_7(%arg0: i32) -> (i32, i32) {
    %c0_i32 = arith.constant 0 : i32
    %c0_i32_0 = arith.constant 0 : i32
    return %arg0, %c0_i32 : i32, i32
  }
}

</mosaic_0001>

<bundles_post_ra>
// kernel: mlp_forward.1
= control target key start
LH: loop header
LB: loop body
LE: loop exit
PB: predicated region body
PF: predicated region fallthrough
CT: control target
= control target key end

     0   :  { %12 = vsyncpa [#allocation3], 0  ;;  %s3234_s0 = inlined_call_operand.vmem [shape: bf16[8,784], index: 0, kind: input, shape index: {}]   ;;  %s3235_s1 = inlined_call_operand.hbm [shape: bf16[784,512], index: 1, kind: input, shape index: {}]   ;;  %s3236_s2 = inlined_call_operand.vmem [shape: f32[1,512], index: 2, kind: input, shape index: {}]   ;;  %s3237_s3 = inlined_call_operand.hbm [shape: bf16[512,256], index: 3, kind: input, shape index: {}]   ;;  %s3238_s4 = inlined_call_operand.vmem [shape: f32[1,256], index: 4, kind: input, shape index: {}]   ;;  %s3239_s5 = inlined_call_operand.vmem [shape: bf16[256,128], index: 5, kind: input, shape index: {}]   ;;  %s3240_s6 = inlined_call_operand.vmem [shape: f32[1,128], index: 6, kind: input, shape index: {}]   ;;  %s3241_s7 = inlined_call_operand.vmem [shape: f32[8,128], index: 7, kind: output, shape index: {}]  }
   0x1   :  { %13 = vsyncpa [#allocation5], 0  ;;  %s3057_s24 = smov [#allocation2]  }
   0x2   :  { %s21_s25 = sshll.u32 %s3057_s24, 4  ;;  %s22_s25 = int_to_ptr.vmem [resolvable:$true] %s21_s25 }
   0x3   :  { %s3021_s26 = scalar_lea.vmem %s22_s25, 25088  ;;  %p3026_p1 = scmp.lt.s32.totalorder %s22_s25, %s22_s25 }
   0x4   :  { %p3022_p0 = scmp.ne.s32.totalorder %s22_s25, %s3021_s26  ;;  %p3027_p2 = scmp.lt.s32.totalorder %s3021_s26, %s3021_s26 }
   0x6   :  { %p3028_p3 = por %p3027_p2, %p3026_p1 }
   0x8   :  { %p3029_p4 = pnand %p3028_p3, %p3022_p0 }
   0xa   :  { %3032 = shalt.err (!%p3029_p4)
}
   0xb   :  { %s3058_s27 = smov 256   ;;  %s3059_s28 = smov 16  }
   0xc   :  { %27 = dma.hbm_to_vmem [thread:$0]  %s3235_s1, 25088, %s22_s25, [#allocation3], %s3058_s27, %s3058_s27, %s3059_s28  }
   0xd   :  { %s3060_s8 = smov [#allocation4]  }
   0xe   :  { %s35_s9 = sshll.u32 %s3060_s8, 4  ;;  %s36_s9 = int_to_ptr.vmem [resolvable:$true] %s35_s9 }
   0xf   :  { %s3041_s10 = scalar_lea.vmem %s36_s9, 8192  ;;  %p3046_p6 = scmp.lt.s32.totalorder %s36_s9, %s36_s9 }
  0x10   :  { %p3042_p5 = scmp.ne.s32.totalorder %s36_s9, %s3041_s10  ;;  %p3047_p7 = scmp.lt.s32.totalorder %s3041_s10, %s3041_s10 }
  0x12   :  { %p3048_p8 = por %p3047_p7, %p3046_p6 }
  0x14   :  { %p3049_p9 = pnand %p3048_p8, %p3042_p5 }
  0x16   :  { %3052 = shalt.err (!%p3049_p9)
}
  0x17   :  { %s3061_s11 = smov 128   ;;  %s3062_s12 = smov 8  }
  0x18   :  { %41 = dma.hbm_to_vmem [thread:$0]  %s3237_s3, 8192, %s36_s9, [#allocation5], %s3061_s11, %s3061_s11, %s3062_s12  }
  0x19   :  { %3053 = dma.done.wait [#allocation3], 25088  }
  0x1a   :  { %3054 = vsyncadd [#allocation3], 4294942208 }
  0x1b   :  { %3055 = dma.done.wait [#allocation5], 8192  }
  0x1c   :  { %3056 = vsyncadd [#allocation5], 4294959104  ;;  %v2600_v0 = vld [vmem:[#allocation2 + $0xe4] ss:$16 sps:$4 sm:$0xff]   ;;  %v2604_v2 = vld [vmem:[#allocation2 + $0xe0] ss:$16 sps:$4 sm:$0xff]  }
  0x1d   :  { %v2602_v1 = vld [vmem:[#allocation2 + $0x2e4] ss:$16 sps:$4 sm:$0xff]   ;;  %1285 = vmatprep.subr.bf16.mxu0 %v2600_v0  ;;  %v2605_v3 = vld [vmem:[#allocation2 + $0x2e0] ss:$16 sps:$4 sm:$0xff]   ;;  %v56_v48 = vld [vmem:[%s3234_s0 + $0x8] sm:$0xff]  ;;  %vm1281_vm0 = vcmask 130048  }
  0x1e   :  { %1326 = vmatprep.subr.bf16.mxu1 %v2602_v1  ;;  %v2606_v4 = vld [vmem:[#allocation2 + $0xc4] ss:$16 sps:$4 sm:$0xff]   ;;  %1286 = vmatpush1.bf16.msra.mxu0 %v2604_v2  ;;  %v2610_v6 = vld [vmem:[#allocation2 + $0xc0] ss:$16 sps:$4 sm:$0xff]   ;;  %v3118_v51 = vcombine.high %v56_v48, %v56_v48 }
  0x1f   :  { %1327 = vmatpush1.bf16.msra.mxu1 %v2605_v3  ;;  %v2608_v5 = vld [vmem:[#allocation2 + $0x2c4] ss:$16 sps:$4 sm:$0xff]   ;;  %1287 = vmatprep.subr.bf16.mxu0 %v2606_v4  ;;  %v2611_v7 = vld [vmem:[#allocation2 + $0x2c0] ss:$16 sps:$4 sm:$0xff]  }
  0x20   :  { %1328 = vmatprep.subr.bf16.mxu1 %v2608_v5  ;;  %v2612_v8 = vld [vmem:[#allocation2 + $0xa4] ss:$16 sps:$4 sm:$0xff]   ;;  %v2616_v10 = vld [vmem:[#allocation2 + $0xa0] ss:$16 sps:$4 sm:$0xff]   ;;  %1358 = vmatprep.mubr.bf16.mxu1 %v3118_v51 }
  0x21   :  { %v2614_v9 = vld [vmem:[#allocation2 + $0x2a4] ss:$16 sps:$4 sm:$0xff]   ;;  %v2617_v11 = vld [vmem:[#allocation2 + $0x2a0] ss:$16 sps:$4 sm:$0xff]  }
  0x22   :  { %1288 = vmatpush1.bf16.msra.mxu0 %v2610_v6  ;;  %v2618_v12 = vld [vmem:[#allocation2 + $0x84] ss:$16 sps:$4 sm:$0xff]   ;;  %v2622_v14 = vld [vmem:[#allocation2 + $0x80] ss:$16 sps:$4 sm:$0xff]  }
  0x23   :  { %1329 = vmatpush1.bf16.msra.mxu1 %v2611_v7  ;;  %1289 = vmatprep.subr.bf16.mxu0 %v2612_v8  ;;  %v2620_v13 = vld [vmem:[#allocation2 + $0x284] ss:$16 sps:$4 sm:$0xff]   ;;  %v2623_v15 = vld [vmem:[#allocation2 + $0x280] ss:$16 sps:$4 sm:$0xff]   ;;  %v3124_v7 = vcombine.low %v56_v48, %v56_v48  ;;  %v2760_v48 = vld [vmem:[#allocation2 + $0x1ec] ss:$16 sps:$4 sm:$0xff]  }
  0x24   :  { %1330 = vmatprep.subr.bf16.mxu1 %v2614_v9  ;;  %v2624_v16 = vld [vmem:[#allocation2 + $0x64] ss:$16 sps:$4 sm:$0xff]   ;;  %v2628_v18 = vld [vmem:[#allocation2 + $0x60] ss:$16 sps:$4 sm:$0xff]  }
  0x25   :  { %v2626_v17 = vld [vmem:[#allocation2 + $0x264] ss:$16 sps:$4 sm:$0xff]   ;;  %v2629_v19 = vld [vmem:[#allocation2 + $0x260] ss:$16 sps:$4 sm:$0xff]  }
  0x26   :  { %1290 = vmatpush1.bf16.msra.mxu0 %v2616_v10  ;;  %v2630_v20 = vld [vmem:[#allocation2 + $0x44] ss:$16 sps:$4 sm:$0xff]   ;;  %v2634_v22 = vld [vmem:[#allocation2 + $0x40] ss:$16 sps:$4 sm:$0xff]  }
  0x27   :  { %1331 = vmatpush1.bf16.msra.mxu1 %v2617_v11  ;;  %1291 = vmatprep.subr.bf16.mxu0 %v2618_v12  ;;  %v2632_v21 = vld [vmem:[#allocation2 + $0x244] ss:$16 sps:$4 sm:$0xff]   ;;  %v2635_v23 = vld [vmem:[#allocation2 + $0x240] ss:$16 sps:$4 sm:$0xff]   ;;  %v2711_v11 = vld [vmem:[#allocation2 + $0xec] ss:$16 sps:$4 sm:$0xff]  }
  0x28   :  { %1332 = vmatprep.subr.bf16.mxu1 %v2620_v13  ;;  %v2636_v24 = vld [vmem:[#allocation2 + $0x24] ss:$16 sps:$4 sm:$0xff]   ;;  %v2640_v26 = vld [vmem:[#allocation2 + $0x20] ss:$16 sps:$4 sm:$0xff]   ;;  %v3063_v13 = vmov 0  }
  0x29   :  { %v2638_v25 = vld [vmem:[#allocation2 + $0x224] ss:$16 sps:$4 sm:$0xff]   ;;  %v2641_v27 = vld [vmem:[#allocation2 + $0x220] ss:$16 sps:$4 sm:$0xff]  }
  0x2a   :  { %1292 = vmatpush1.bf16.msra.mxu0 %v2622_v14  ;;  %v2642_v28 = vld [vmem:[#allocation2 + $0x4] ss:$16 sps:$4 sm:$0xff]   ;;  %v2646_v30 = vld [vmem:[#allocation2] ss:$16 sps:$4 sm:$0xff]  }
  0x2b   :  { %1333 = vmatpush1.bf16.msra.mxu1 %v2623_v15  ;;  %1293 = vmatprep.subr.bf16.mxu0 %v2624_v16  ;;  %v2644_v29 = vld [vmem:[#allocation2 + $0x204] ss:$16 sps:$4 sm:$0xff]   ;;  %v2647_v31 = vld [vmem:[#allocation2 + $0x200] ss:$16 sps:$4 sm:$0xff]   ;;  %v2709_v15 = vld [vmem:[#allocation2 + $0xe8] ss:$16 sps:$4 sm:$0xff]  }
  0x2c   :  { %1334 = vmatprep.subr.bf16.mxu1 %v2626_v17  ;;  %v2648_v32 = vld [vmem:[#allocation2 + $0x1e4] ss:$16 sps:$4 sm:$0xff]   ;;  %v2652_v34 = vld [vmem:[#allocation2 + $0x1e0] ss:$16 sps:$4 sm:$0xff]   ;;  %v3132_v17 = vld [vmem:[%s3234_s0 + $0x18] ss:$0 sps:$4 sm:$0xff]  }
  0x2d   :  { %v2650_v33 = vld [vmem:[#allocation2 + $0x3e4] ss:$16 sps:$4 sm:$0xff]   ;;  %v2653_v35 = vld [vmem:[#allocation2 + $0x3e0] ss:$16 sps:$4 sm:$0xff]  }
  0x2e   :  { %1294 = vmatpush1.bf16.msra.mxu0 %v2628_v18  ;;  %v2654_v36 = vld [vmem:[#allocation2 + $0x1c4] ss:$16 sps:$4 sm:$0xff]   ;;  %v2658_v38 = vld [vmem:[#allocation2 + $0x1c0] ss:$16 sps:$4 sm:$0xff]   ;;  %v2718_v18 = vld [vmem:[#allocation2 + $0xcc] ss:$16 sps:$4 sm:$0xff]  }
  0x2f   :  { %1335 = vmatpush1.bf16.msra.mxu1 %v2629_v19  ;;  %1295 = vmatprep.subr.bf16.mxu0 %v2630_v20  ;;  %v2656_v37 = vld [vmem:[#allocation2 + $0x3c4] ss:$16 sps:$4 sm:$0xff]   ;;  %v2659_v39 = vld [vmem:[#allocation2 + $0x3c0] ss:$16 sps:$4 sm:$0xff]   ;;  %v2716_v20 = vld [vmem:[#allocation2 + $0xc8] ss:$16 sps:$4 sm:$0xff]  }
  0x30   :  { %1336 = vmatprep.subr.bf16.mxu1 %v2632_v21  ;;  %v2660_v40 = vld [vmem:[#allocation2 + $0x1a4] ss:$16 sps:$4 sm:$0xff]   ;;  %v2664_v42 = vld [vmem:[#allocation2 + $0x1a0] ss:$16 sps:$4 sm:$0xff]  }
  0x31   :  { %v2662_v41 = vld [vmem:[#allocation2 + $0x3a4] ss:$16 sps:$4 sm:$0xff]   ;;  %v2665_v43 = vld [vmem:[#allocation2 + $0x3a0] ss:$16 sps:$4 sm:$0xff]  }
  0x32   :  { %1296 = vmatpush1.bf16.msra.mxu0 %v2634_v22  ;;  %v2666_v44 = vld [vmem:[#allocation2 + $0x184] ss:$16 sps:$4 sm:$0xff]   ;;  %v2670_v49 = vld [vmem:[#allocation2 + $0x180] ss:$16 sps:$4 sm:$0xff]   ;;  %v2724_v22 = vld [vmem:[#allocation2 + $0xac] ss:$16 sps:$4 sm:$0xff]  }
  0x33   :  { %1337 = vmatpush1.bf16.msra.mxu1 %v2635_v23  ;;  %1297 = vmatprep.subr.bf16.mxu0 %v2636_v24  ;;  %v2668_v45 = vld [vmem:[#allocation2 + $0x384] ss:$16 sps:$4 sm:$0xff]   ;;  %v2671_v50 = vld [vmem:[#allocation2 + $0x380] ss:$16 sps:$4 sm:$0xff]   ;;  %v2722_v24 = vld [vmem:[#allocation2 + $0xa8] ss:$16 sps:$4 sm:$0xff]  }
  0x34   :  { %1338 = vmatprep.subr.bf16.mxu1 %v2638_v25  ;;  %v55_v46 = vld [vmem:[%s3234_s0] sm:$0xff] }
  0x35   :  { %v3113_v47 = vcombine.high %v55_v46, %v55_v46  ;;  %v2672_v52 = vld [vmem:[#allocation2 + $0x164] ss:$16 sps:$4 sm:$0xff]   ;;  %v2676_v54 = vld [vmem:[#allocation2 + $0x160] ss:$16 sps:$4 sm:$0xff]   ;;  %v3122_v6 = vcombine.low %v55_v46, %v55_v46  ;;  %v2752_v46 = vld [vmem:[#allocation2 + $0x8] ss:$16 sps:$4 sm:$0xff]  }
  0x36   :  { %1298 = vmatpush1.bf16.msra.mxu0 %v2640_v26  ;;  %v2674_v53 = vld [vmem:[#allocation2 + $0x364] ss:$16 sps:$4 sm:$0xff]   ;;  %v2677_v55 = vld [vmem:[#allocation2 + $0x360] ss:$16 sps:$4 sm:$0xff]   ;;  %v2730_v26 = vld [vmem:[#allocation2 + $0x8c] ss:$16 sps:$4 sm:$0xff]  }
  0x37   :  { %1339 = vmatpush1.bf16.msra.mxu1 %v2641_v27  ;;  %1299 = vmatprep.subr.bf16.mxu0 %v2642_v28  ;;  %v2678_v56 = vld [vmem:[#allocation2 + $0x144] ss:$16 sps:$4 sm:$0xff]   ;;  %v2682_v58 = vld [vmem:[#allocation2 + $0x140] ss:$16 sps:$4 sm:$0xff]   ;;  %v2728_v28 = vld [vmem:[#allocation2 + $0x88] ss:$16 sps:$4 sm:$0xff]  }
  0x38   :  { %1340 = vmatprep.subr.bf16.mxu1 %v2644_v29  ;;  %1317 = vmatprep.mubr.bf16.mxu0 %v3113_v47  ;;  %v2680_v57 = vld [vmem:[#allocation2 + $0x344] ss:$16 sps:$4 sm:$0xff]   ;;  %v2683_v59 = vld [vmem:[#allocation2 + $0x340] ss:$16 sps:$4 sm:$0xff]  }
  0x39   :  { %v2684_v60 = vld [vmem:[#allocation2 + $0x124] ss:$16 sps:$4 sm:$0xff]   ;;  %v2688_v62 = vld [vmem:[#allocation2 + $0x120] ss:$16 sps:$4 sm:$0xff]  }
  0x3a   :  { %1300 = vmatpush1.bf16.msra.mxu0 %v2646_v30  ;;  %v2686_v61 = vld [vmem:[#allocation2 + $0x324] ss:$16 sps:$4 sm:$0xff]   ;;  %v2689_v63 = vld [vmem:[#allocation2 + $0x320] ss:$16 sps:$4 sm:$0xff]   ;;  %v2736_v30 = vld [vmem:[#allocation2 + $0x6c] ss:$16 sps:$4 sm:$0xff]  }
  0x3b   :  { %1341 = vmatpush1.bf16.msra.mxu1 %v2647_v31  ;;  %1301 = vmatprep.subr.bf16.mxu0 %v2648_v32  ;;  %v2690_v0 = vld [vmem:[#allocation2 + $0x104] ss:$16 sps:$4 sm:$0xff]   ;;  %v2694_v2 = vld [vmem:[#allocation2 + $0x100] ss:$16 sps:$4 sm:$0xff]  }
  0x3c   :  { %1342 = vmatprep.subr.bf16.mxu1 %v2650_v33  ;;  %v2692_v1 = vld [vmem:[#allocation2 + $0x304] ss:$16 sps:$4 sm:$0xff]   ;;  %v2695_v3 = vld [vmem:[#allocation2 + $0x300] ss:$16 sps:$4 sm:$0xff]  }
  0x3d   :  { %v2702_v4 = vld [vmem:[#allocation2 + $0x4e4] ss:$16 sps:$4 sm:$0xff]   ;;  %v2700_v8 = vld [vmem:[#allocation2 + $0x4e0] ss:$16 sps:$4 sm:$0xff]  }
  0x3e   :  { %1302 = vmatpush2.bf16.msra.mxu0 %v2652_v34  ;;  %v2705_v5 = vld [vmem:[#allocation2 + $0x604] ss:$16 sps:$4 sm:$0xff]   ;;  %v2703_v9 = vld [vmem:[#allocation2 + $0x600] ss:$16 sps:$4 sm:$0xff]   ;;  %v2734_v34 = vld [vmem:[#allocation2 + $0x68] ss:$16 sps:$4 sm:$0xff]  }
  0x3f   :  { %1343 = vmatpush2.bf16.msra.mxu1 %v2653_v35  ;;  %1303 = vmatprep.subr.bf16.mxu0 %v2654_v36  ;;  %v2708_v10 = vld [vmem:[#allocation2 + $0x4c4] ss:$16 sps:$4 sm:$0xff]   ;;  %v2706_v12 = vld [vmem:[#allocation2 + $0x4c0] ss:$16 sps:$4 sm:$0xff]   ;;  %v2742_v36 = vld [vmem:[#allocation2 + $0x4c] ss:$16 sps:$4 sm:$0xff]  }
  0x40   :  { %1344 = vmatprep.subr.bf16.mxu1 %v2656_v37  ;;  %v2714_v14 = vld [vmem:[#allocation2 + $0x4a4] ss:$16 sps:$4 sm:$0xff]   ;;  %v2712_v16 = vld [vmem:[#allocation2 + $0x4a0] ss:$16 sps:$4 sm:$0xff]  }
  0x41   :  { %v2721_v19 = vld [vmem:[#allocation2 + $0x484] ss:$16 sps:$4 sm:$0xff]   ;;  %v2719_v21 = vld [vmem:[#allocation2 + $0x480] ss:$16 sps:$4 sm:$0xff]  }
  0x42   :  { %1304 = vmatpush2.bf16.msra.mxu0 %v2658_v38  ;;  %v2727_v23 = vld [vmem:[#allocation2 + $0x464] ss:$16 sps:$4 sm:$0xff]   ;;  %v2725_v25 = vld [vmem:[#allocation2 + $0x460] ss:$16 sps:$4 sm:$0xff]   ;;  %v2740_v38 = vld [vmem:[#allocation2 + $0x48] ss:$16 sps:$4 sm:$0xff]  }
  0x43   :  { %1345 = vmatpush2.bf16.msra.mxu1 %v2659_v39  ;;  %1305 = vmatprep.subr.bf16.mxu0 %v2660_v40  ;;  %v2733_v27 = vld [vmem:[#allocation2 + $0x444] ss:$16 sps:$4 sm:$0xff]   ;;  %v2731_v29 = vld [vmem:[#allocation2 + $0x440] ss:$16 sps:$4 sm:$0xff]   ;;  %v2748_v40 = vld [vmem:[#allocation2 + $0x2c] ss:$16 sps:$4 sm:$0xff]  }
  0x44   :  { %1346 = vmatprep.subr.bf16.mxu1 %v2662_v41  ;;  %v2739_v31 = vld [vmem:[#allocation2 + $0x424] ss:$16 sps:$4 sm:$0xff]   ;;  %v2737_v35 = vld [vmem:[#allocation2 + $0x420] ss:$16 sps:$4 sm:$0xff]  }
  0x45   :  { %v3140_v32 = vld [vmem:[%s3234_s0 + $0x10] sm:$0xff] }
  0x46   :  { %1306 = vmatpush2.bf16.msra.mxu0 %v2664_v42  ;;  %v3144_v33 = vcombine.high %v3140_v32, %v3140_v32  ;;  %v2745_v37 = vld [vmem:[#allocation2 + $0x404] ss:$16 sps:$4 sm:$0xff]   ;;  %v2743_v39 = vld [vmem:[#allocation2 + $0x400] ss:$16 sps:$4 sm:$0xff]   ;;  %v2746_v42 = vld [vmem:[#allocation2 + $0x28] ss:$16 sps:$4 sm:$0xff]  }
  0x47   :  { %1347 = vmatpush2.bf16.msra.mxu1 %v2665_v43  ;;  %1307 = vmatprep.subr.bf16.mxu0 %v2666_v44  ;;  %v2751_v41 = vld [vmem:[#allocation2 + $0x5e4] ss:$16 sps:$4 sm:$0xff]   ;;  %v2749_v43 = vld [vmem:[#allocation2 + $0x5e0] ss:$16 sps:$4 sm:$0xff]   ;;  %v2754_v44 = vld [vmem:[#allocation2 + $0xc] ss:$16 sps:$4 sm:$0xff]  }
  0x48   :  { %1348 = vmatprep.subr.bf16.mxu1 %v2668_v45  ;;  %v2757_v45 = vld [vmem:[#allocation2 + $0x5c4] ss:$16 sps:$4 sm:$0xff]  }
  0x4a   :  { %1308 = vmatpush2.bf16.msra.mxu0 %v2670_v49  ;;  %v2763_v49 = vld [vmem:[#allocation2 + $0x5a4] ss:$16 sps:$4 sm:$0xff]  }
  0x4b   :  { %1349 = vmatpush2.bf16.msra.mxu1 %v2671_v50  ;;  %1309 = vmatprep.subr.bf16.mxu0 %v2672_v52  ;;  %v2758_v50 = vld [vmem:[#allocation2 + $0x1e8] ss:$16 sps:$4 sm:$0xff]   ;;  %v2761_v52 = vld [vmem:[#allocation2 + $0x5a0] ss:$16 sps:$4 sm:$0xff]  }
  0x4c   :  { %1350 = vmatprep.subr.bf16.mxu1 %v2674_v53  ;;  %v2766_v53 = vld [vmem:[#allocation2 + $0x1cc] ss:$16 sps:$4 sm:$0xff]  }
  0x4e   :  { %1310 = vmatpush2.bf16.msra.mxu0 %v2676_v54  ;;  %v2769_v54 = vld [vmem:[#allocation2 + $0x584] ss:$16 sps:$4 sm:$0xff]  }
  0x4f   :  { %1351 = vmatpush2.bf16.msra.mxu1 %v2677_v55  ;;  %1311 = vmatprep.subr.bf16.mxu0 %v2678_v56  ;;  %v2764_v55 = vld [vmem:[#allocation2 + $0x1c8] ss:$16 sps:$4 sm:$0xff]   ;;  %v2767_v56 = vld [vmem:[#allocation2 + $0x580] ss:$16 sps:$4 sm:$0xff]  }
  0x50   :  { %1352 = vmatprep.subr.bf16.mxu1 %v2680_v57  ;;  %v2772_v57 = vld [vmem:[#allocation2 + $0x1ac] ss:$16 sps:$4 sm:$0xff]  }
  0x52   :  { %1312 = vmatpush2.bf16.msra.mxu0 %v2682_v58  ;;  %v2775_v58 = vld [vmem:[#allocation2 + $0x564] ss:$16 sps:$4 sm:$0xff]  }
  0x53   :  { %1353 = vmatpush2.bf16.msra.mxu1 %v2683_v59  ;;  %1313 = vmatprep.subr.bf16.mxu0 %v2684_v60  ;;  %v2770_v59 = vld [vmem:[#allocation2 + $0x1a8] ss:$16 sps:$4 sm:$0xff]   ;;  %v2773_v60 = vld [vmem:[#allocation2 + $0x560] ss:$16 sps:$4 sm:$0xff]  }
  0x54   :  { %1354 = vmatprep.subr.bf16.mxu1 %v2686_v61  ;;  %v2778_v61 = vld [vmem:[#allocation2 + $0x18c] ss:$16 sps:$4 sm:$0xff]  }
  0x56   :  { %1314 = vmatpush2.bf16.msra.mxu0 %v2688_v62  ;;  %v2781_v62 = vld [vmem:[#allocation2 + $0x544] ss:$16 sps:$4 sm:$0xff]  }
  0x57   :  { %1355 = vmatpush2.bf16.msra.mxu1 %v2689_v63  ;;  %1315 = vmatprep.subr.bf16.mxu0 %v2690_v0  ;;  %v2776_v63 = vld [vmem:[#allocation2 + $0x188] ss:$16 sps:$4 sm:$0xff]   ;;  %v2779_v0 = vld [vmem:[#allocation2 + $0x540] ss:$16 sps:$4 sm:$0xff]  }
  0x58   :  { %1356 = vmatprep.subr.bf16.mxu1 %v2692_v1  ;;  %v2784_v1 = vld [vmem:[#allocation2 + $0x16c] ss:$16 sps:$4 sm:$0xff]  }
  0x5a   :  { %1316 = vmatpush2.bf16.msra.mxu0 %v2694_v2  ;;  %v2787_v2 = vld [vmem:[#allocation2 + $0x524] ss:$16 sps:$4 sm:$0xff]  }
  0x5b   :  { %1357 = vmatpush2.bf16.msra.mxu1 %v2695_v3  ;;  %1367 = vmatprep.subr.bf16.mxu0 %v2702_v4  ;;  %v2782_v3 = vld [vmem:[#allocation2 + $0x168] ss:$16 sps:$4 sm:$0xff]   ;;  %v2785_v4 = vld [vmem:[#allocation2 + $0x520] ss:$16 sps:$4 sm:$0xff]  }
  0x5c   :  { %1422 = vmatprep.subr.bf16.mxu1 %v2705_v5  ;;  %v2790_v5 = vld [vmem:[#allocation2 + $0x14c] ss:$16 sps:$4 sm:$0xff]  }
  0x5d   :  { %1318 = vmatmul.mubr.bf16.vlgmr.msra.gmra.mxu0 %v3122_v6 }
  0x5e   :  { %1359 = vmatmul.mubr.bf16.vlgmr.msra.gmra.mxu1 %v3124_v7  ;;  %1368 = vmatpush1.bf16.msra.mxu0 %v2700_v8  ;;  %v2793_v8 = vld [vmem:[#allocation2 + $0x504] ss:$16 sps:$4 sm:$0xff]  }
  0x5f   :  { %1423 = vmatpush1.bf16.msra.mxu1 %v2703_v9  ;;  %1369 = vmatprep.subr.bf16.mxu0 %v2708_v10  ;;  %v2788_v9 = vld [vmem:[#allocation2 + $0x148] ss:$16 sps:$4 sm:$0xff]   ;;  %v2791_v10 = vld [vmem:[#allocation2 + $0x500] ss:$16 sps:$4 sm:$0xff]  }
  0x60   :  { %1440 = vmatprep.mubr.bf16.mxu1 %v3063_v13  ;;  %1449 = vmatprep.subr.bf16.mxu1 %v2711_v11  ;;  %v2798_v11 = vld [vmem:[#allocation2 + $0x12c] ss:$16 sps:$4 sm:$0xff]  }
  0x61   :  { %1399 = vmatprep.mubr.bf16.mxu0 %v3144_v33 }
  0x62   :  { %1370 = vmatpush1.bf16.msra.mxu0 %v2706_v12  ;;  %v2801_v12 = vld [vmem:[#allocation2 + $0x2ec] ss:$16 sps:$4 sm:$0xff]  }
  0x63   :  { %1371 = vmatprep.subr.bf16.mxu0 %v2714_v14  ;;  %v3149_v14 = vcombine.low %v3140_v32, %v3140_v32  ;;  %v2820_v32 = vld [vmem:[#allocation2 + $0x4a8] ss:$16 sps:$4 sm:$0xff]  }
  0x66   :  { %2488 = vmatmul.mubr.msk.bf16.vlgmr.msra.gmra.mxu1 %vm1281_vm0, %v3132_v17  ;;  %1372 = vmatpush1.bf16.msra.mxu0 %v2712_v16  ;;  %v2799_v16 = vld [vmem:[#allocation2 + $0x2e8] ss:$16 sps:$4 sm:$0xff]  }
  0x67   :  { %1450 = vmatpush1.bf16.msra.mxu1 %v2709_v15  ;;  %1373 = vmatprep.subr.bf16.mxu0 %v2721_v19  ;;  %v2796_v15 = vld [vmem:[#allocation2 + $0x128] ss:$16 sps:$4 sm:$0xff]   ;;  %v2807_v19 = vld [vmem:[#allocation2 + $0x2cc] ss:$16 sps:$4 sm:$0xff]  }
  0x68   :  { %1451 = vmatprep.subr.bf16.mxu1 %v2718_v18  ;;  %1481 = vmatprep.mubr.bf16.mxu1 %v3113_v47  ;;  %v2755_v47 = vld [vmem:[#allocation2 + $0x5c0] ss:$16 sps:$4 sm:$0xff]   ;;  %v2804_v18 = vld [vmem:[#allocation2 + $0x10c] ss:$16 sps:$4 sm:$0xff]  }
  0x6a   :  { %1374 = vmatpush1.bf16.msra.mxu0 %v2719_v21  ;;  %v2805_v21 = vld [vmem:[#allocation2 + $0x2c8] ss:$16 sps:$4 sm:$0xff]  }
  0x6b   :  { %1452 = vmatpush1.bf16.msra.mxu1 %v2716_v20  ;;  %1375 = vmatprep.subr.bf16.mxu0 %v2727_v23  ;;  %v2802_v20 = vld [vmem:[#allocation2 + $0x108] ss:$16 sps:$4 sm:$0xff]   ;;  %v2813_v23 = vld [vmem:[#allocation2 + $0x2ac] ss:$16 sps:$4 sm:$0xff]  }
  0x6c   :  { %1453 = vmatprep.subr.bf16.mxu1 %v2724_v22  ;;  %v2810_v22 = vld [vmem:[#allocation2 + $0x4ec] ss:$16 sps:$4 sm:$0xff]  }
  0x6e   :  { %1376 = vmatpush1.bf16.msra.mxu0 %v2725_v25  ;;  %v2811_v25 = vld [vmem:[#allocation2 + $0x2a8] ss:$16 sps:$4 sm:$0xff]  }
  0x6f   :  { %1454 = vmatpush1.bf16.msra.mxu1 %v2722_v24  ;;  %1377 = vmatprep.subr.bf16.mxu0 %v2733_v27  ;;  %v2808_v24 = vld [vmem:[#allocation2 + $0x4e8] ss:$16 sps:$4 sm:$0xff]   ;;  %v2819_v27 = vld [vmem:[#allocation2 + $0x28c] ss:$16 sps:$4 sm:$0xff]  }
  0x70   :  { %1455 = vmatprep.subr.bf16.mxu1 %v2730_v26  ;;  %v2816_v26 = vld [vmem:[#allocation2 + $0x4cc] ss:$16 sps:$4 sm:$0xff]  }
  0x72   :  { %1378 = vmatpush1.bf16.msra.mxu0 %v2731_v29  ;;  %v2817_v29 = vld [vmem:[#allocation2 + $0x288] ss:$16 sps:$4 sm:$0xff]  }
  0x73   :  { %1456 = vmatpush1.bf16.msra.mxu1 %v2728_v28  ;;  %1379 = vmatprep.subr.bf16.mxu0 %v2739_v31  ;;  %v2814_v28 = vld [vmem:[#allocation2 + $0x4c8] ss:$16 sps:$4 sm:$0xff]   ;;  %v2825_v31 = vld [vmem:[#allocation2 + $0x26c] ss:$16 sps:$4 sm:$0xff]  }
  0x74   :  { %1457 = vmatprep.subr.bf16.mxu1 %v2736_v30  ;;  %v2822_v30 = vld [vmem:[#allocation2 + $0x4ac] ss:$16 sps:$4 sm:$0xff]  }
  0x76   :  { %1380 = vmatpush1.bf16.msra.mxu0 %v2737_v35  ;;  %v2831_v35 = vld [vmem:[#allocation2 + $0x24c] ss:$16 sps:$4 sm:$0xff]  }
  0x77   :  { %1458 = vmatpush1.bf16.msra.mxu1 %v2734_v34  ;;  %1381 = vmatprep.subr.bf16.mxu0 %v2745_v37  ;;  %v2828_v34 = vld [vmem:[#allocation2 + $0x48c] ss:$16 sps:$4 sm:$0xff]  }
  0x78   :  { %1459 = vmatprep.subr.bf16.mxu1 %v2742_v36  ;;  %v2826_v36 = vld [vmem:[#allocation2 + $0x488] ss:$16 sps:$4 sm:$0xff]   ;;  %v2834_v37 = vld [vmem:[#allocation2 + $0x46c] ss:$16 sps:$4 sm:$0xff]  }
  0x7a   :  { %1382 = vmatpush1.bf16.msra.mxu0 %v2743_v39  ;;  %v2832_v39 = vld [vmem:[#allocation2 + $0x468] ss:$16 sps:$4 sm:$0xff]  }
  0x7b   :  { %1460 = vmatpush1.bf16.msra.mxu1 %v2740_v38  ;;  %1383 = vmatprep.subr.bf16.mxu0 %v2751_v41  ;;  %v2837_v38 = vld [vmem:[#allocation2 + $0x22c] ss:$16 sps:$4 sm:$0xff]  }
  0x7c   :  { %1461 = vmatprep.subr.bf16.mxu1 %v2748_v40  ;;  %v2835_v40 = vld [vmem:[#allocation2 + $0x228] ss:$16 sps:$4 sm:$0xff]   ;;  %v2843_v41 = vld [vmem:[#allocation2 + $0x20c] ss:$16 sps:$4 sm:$0xff]  }
  0x7e   :  { %1384 = vmatpush2.bf16.msra.mxu0 %v2749_v43  ;;  %v2841_v43 = vld [vmem:[#allocation2 + $0x208] ss:$16 sps:$4 sm:$0xff]  }
  0x7f   :  { %1462 = vmatpush1.bf16.msra.mxu1 %v2746_v42  ;;  %1385 = vmatprep.subr.bf16.mxu0 %v2757_v45  ;;  %v2838_v42 = vld [vmem:[#allocation2 + $0x448] ss:$16 sps:$4 sm:$0xff]   ;;  %v2849_v45 = vld [vmem:[#allocation2 + $0x3ec] ss:$16 sps:$4 sm:$0xff]  }
  0x80   :  { %1463 = vmatprep.subr.bf16.mxu1 %v2754_v44  ;;  %v2846_v44 = vld [vmem:[#allocation2 + $0x42c] ss:$16 sps:$4 sm:$0xff]  }
  0x82   :  { %1386 = vmatpush2.bf16.msra.mxu0 %v2755_v47  ;;  %v2847_v47 = vld [vmem:[#allocation2 + $0x3e8] ss:$16 sps:$4 sm:$0xff]  }
  0x83   :  { %1464 = vmatpush1.bf16.msra.mxu1 %v2752_v46  ;;  %1387 = vmatprep.subr.bf16.mxu0 %v2763_v49  ;;  %v2844_v46 = vld [vmem:[#allocation2 + $0x428] ss:$16 sps:$4 sm:$0xff]   ;;  %v2855_v49 = vld [vmem:[#allocation2 + $0x3cc] ss:$16 sps:$4 sm:$0xff]  }
  0x84   :  { %1465 = vmatprep.subr.bf16.mxu1 %v2760_v48  ;;  %v2852_v48 = vld [vmem:[#allocation2 + $0x40c] ss:$16 sps:$4 sm:$0xff]  }
  0x86   :  { %1388 = vmatpush2.bf16.msra.mxu0 %v2761_v52  ;;  %v2853_v52 = vld [vmem:[#allocation2 + $0x3c8] ss:$16 sps:$4 sm:$0xff]  }
  0x87   :  { %1466 = vmatpush2.bf16.msra.mxu1 %v2758_v50  ;;  %1389 = vmatprep.subr.bf16.mxu0 %v2769_v54  ;;  %v2850_v50 = vld [vmem:[#allocation2 + $0x408] ss:$16 sps:$4 sm:$0xff]   ;;  %v2861_v54 = vld [vmem:[#allocation2 + $0x3ac] ss:$16 sps:$4 sm:$0xff]  }
  0x88   :  { %1467 = vmatprep.subr.bf16.mxu1 %v2766_v53  ;;  %v2858_v53 = vld [vmem:[#allocation2 + $0x5ec] ss:$16 sps:$4 sm:$0xff]  }
  0x8a   :  { %1390 = vmatpush2.bf16.msra.mxu0 %v2767_v56  ;;  %v2859_v56 = vld [vmem:[#allocation2 + $0x3a8] ss:$16 sps:$4 sm:$0xff]  }
  0x8b   :  { %1468 = vmatpush2.bf16.msra.mxu1 %v2764_v55  ;;  %1391 = vmatprep.subr.bf16.mxu0 %v2775_v58  ;;  %v2856_v55 = vld [vmem:[#allocation2 + $0x5e8] ss:$16 sps:$4 sm:$0xff]   ;;  %v2867_v58 = vld [vmem:[#allocation2 + $0x38c] ss:$16 sps:$4 sm:$0xff]  }
  0x8c   :  { %1469 = vmatprep.subr.bf16.mxu1 %v2772_v57  ;;  %v2864_v57 = vld [vmem:[#allocation2 + $0x5cc] ss:$16 sps:$4 sm:$0xff]  }
  0x8e   :  { %1392 = vmatpush2.bf16.msra.mxu0 %v2773_v60  ;;  %v2865_v60 = vld [vmem:[#allocation2 + $0x388] ss:$16 sps:$4 sm:$0xff]  }
  0x8f   :  { %1470 = vmatpush2.bf16.msra.mxu1 %v2770_v59  ;;  %1393 = vmatprep.subr.bf16.mxu0 %v2781_v62  ;;  %v2862_v59 = vld [vmem:[#allocation2 + $0x5c8] ss:$16 sps:$4 sm:$0xff]   ;;  %v2873_v62 = vld [vmem:[#allocation2 + $0x36c] ss:$16 sps:$4 sm:$0xff]  }
  0x90   :  { %1471 = vmatprep.subr.bf16.mxu1 %v2778_v61  ;;  %v2870_v61 = vld [vmem:[#allocation2 + $0x5ac] ss:$16 sps:$4 sm:$0xff]  }
  0x92   :  { %1394 = vmatpush2.bf16.msra.mxu0 %v2779_v0  ;;  %v2871_v0 = vld [vmem:[#allocation2 + $0x368] ss:$16 sps:$4 sm:$0xff]  }
  0x93   :  { %1472 = vmatpush2.bf16.msra.mxu1 %v2776_v63  ;;  %1395 = vmatprep.subr.bf16.mxu0 %v2787_v2  ;;  %v2868_v63 = vld [vmem:[#allocation2 + $0x5a8] ss:$16 sps:$4 sm:$0xff]   ;;  %v2879_v2 = vld [vmem:[#allocation2 + $0x34c] ss:$16 sps:$4 sm:$0xff]  }
  0x94   :  { %1473 = vmatprep.subr.bf16.mxu1 %v2784_v1  ;;  %v2876_v1 = vld [vmem:[#allocation2 + $0x58c] ss:$16 sps:$4 sm:$0xff]  }
  0x96   :  { %1396 = vmatpush2.bf16.msra.mxu0 %v2785_v4  ;;  %v2877_v4 = vld [vmem:[#allocation2 + $0x348] ss:$16 sps:$4 sm:$0xff]  }
  0x97   :  { %1474 = vmatpush2.bf16.msra.mxu1 %v2782_v3  ;;  %1397 = vmatprep.subr.bf16.mxu0 %v2793_v8  ;;  %v2874_v3 = vld [vmem:[#allocation2 + $0x588] ss:$16 sps:$4 sm:$0xff]   ;;  %v2885_v8 = vld [vmem:[#allocation2 + $0x32c] ss:$16 sps:$4 sm:$0xff]  }
  0x98   :  { %1475 = vmatprep.subr.bf16.mxu1 %v2790_v5  ;;  %v2882_v5 = vld [vmem:[#allocation2 + $0x56c] ss:$16 sps:$4 sm:$0xff]  }
  0x9a   :  { %1398 = vmatpush2.bf16.msra.mxu0 %v2791_v10  ;;  %v2883_v10 = vld [vmem:[#allocation2 + $0x328] ss:$16 sps:$4 sm:$0xff]  }
  0x9b   :  { %1476 = vmatpush2.bf16.msra.mxu1 %v2788_v9  ;;  %1490 = vmatprep.subr.bf16.mxu0 %v2801_v12  ;;  %v2880_v9 = vld [vmem:[#allocation2 + $0x568] ss:$16 sps:$4 sm:$0xff]   ;;  %v2891_v12 = vld [vmem:[#allocation2 + $0x30c] ss:$16 sps:$4 sm:$0xff]  }
  0x9c   :  { %1477 = vmatprep.subr.bf16.mxu1 %v2798_v11  ;;  %v2888_v11 = vld [vmem:[#allocation2 + $0x54c] ss:$16 sps:$4 sm:$0xff]  }
  0x9d   :  { %1400 = vmatmul.mubr.bf16.vlgmr.msra.gmra.mxu0 %v3149_v14 }
  0x9e   :  { %1491 = vmatpush1.bf16.msra.mxu0 %v2799_v16  ;;  %1522 = vmatprep.mubr.bf16.mxu0 %v3118_v51  ;;  %v2823_v51 = vld [vmem:[#allocation2 + $0x268] ss:$16 sps:$4 sm:$0xff]  }
  0x9f   :  { %1478 = vmatpush2.bf16.msra.mxu1 %v2796_v15  ;;  %1492 = vmatprep.subr.bf16.mxu0 %v2807_v19  ;;  %v2886_v15 = vld [vmem:[#allocation2 + $0x548] ss:$16 sps:$4 sm:$0xff]   ;;  %v2903_v19 = vld [vmem:[#allocation4 + $0x74] ss:$8 sps:$4 sm:$0xff]  }
  0xa0   :  { %1479 = vmatprep.subr.bf16.mxu1 %v2804_v18  ;;  %v2889_v16 = vld [vmem:[#allocation2 + $0x308] ss:$16 sps:$4 sm:$0xff]   ;;  %v2894_v18 = vld [vmem:[#allocation2 + $0x52c] ss:$16 sps:$4 sm:$0xff]  }
  0xa2   :  { %1493 = vmatpush1.bf16.msra.mxu0 %v2805_v21  ;;  %v2901_v21 = vld [vmem:[#allocation4 + $0x70] ss:$8 sps:$4 sm:$0xff]  }
  0xa3   :  { %1480 = vmatpush2.bf16.msra.mxu1 %v2802_v20  ;;  %1494 = vmatprep.subr.bf16.mxu0 %v2813_v23  ;;  %v2892_v20 = vld [vmem:[#allocation2 + $0x528] ss:$16 sps:$4 sm:$0xff]   ;;  %v2906_v23 = vld [vmem:[#allocation4 + $0x64] ss:$8 sps:$4 sm:$0xff]  }
  0xa4   :  { %1531 = vmatprep.subr.bf16.mxu1 %v2810_v22  ;;  %v2897_v22 = vld [vmem:[#allocation2 + $0x50c] ss:$16 sps:$4 sm:$0xff]  }
  0xa6   :  { %1482 = vmatmul.mubr.bf16.vlgmr.msra.gmra.mxu1 %v3122_v6  ;;  %1495 = vmatpush1.bf16.msra.mxu0 %v2811_v25  ;;  %v2829_v6 = vld [vmem:[#allocation2 + $0x248] ss:$16 sps:$4 sm:$0xff]  }
  0xa7   :  { %1532 = vmatpush1.bf16.msra.mxu1 %v2808_v24  ;;  %1496 = vmatprep.subr.bf16.mxu0 %v2819_v27  ;;  %v2895_v24 = vld [vmem:[#allocation2 + $0x508] ss:$16 sps:$4 sm:$0xff]   ;;  %v2909_v27 = vld [vmem:[#allocation4 + $0x54] ss:$8 sps:$4 sm:$0xff]  }
  0xa8   :  { %1533 = vmatprep.subr.bf16.mxu1 %v2816_v26  ;;  %1563 = vmatprep.mubr.bf16.mxu1 %v3144_v33  ;;  %v2840_v33 = vld [vmem:[#allocation2 + $0x44c] ss:$16 sps:$4 sm:$0xff]   ;;  %v2904_v25 = vld [vmem:[#allocation4 + $0x60] ss:$8 sps:$4 sm:$0xff]  }
  0xa9   :  { %v2900_v26 = vld [vmem:[#allocation2 + $0x60c] ss:$16 sps:$4 sm:$0xff]  }
  0xaa   :  { %1497 = vmatpush1.bf16.msra.mxu0 %v2817_v29  ;;  %v2907_v29 = vld [vmem:[#allocation4 + $0x50] ss:$8 sps:$4 sm:$0xff]  }
  0xab   :  { %1534 = vmatpush1.bf16.msra.mxu1 %v2814_v28  ;;  %1498 = vmatprep.subr.bf16.mxu0 %v2825_v31  ;;  %v2898_v28 = vld [vmem:[#allocation2 + $0x608] ss:$16 sps:$4 sm:$0xff]   ;;  %v2915_v31 = vld [vmem:[#allocation4 + $0x34] ss:$8 sps:$4 sm:$0xff]  }
  0xac   :  { %1535 = vmatprep.subr.bf16.mxu1 %v2822_v30  ;;  %v2912_v30 = vld [vmem:[#allocation4 + $0x44] ss:$8 sps:$4 sm:$0xff]  }
  0xae   :  { %1499 = vmatpush1.bf16.msra.mxu0 %v2823_v51  ;;  %v2949_v51 = vld [vmem:[#allocation4 + $0x170] ss:$8 sps:$4 sm:$0xff]  }
  0xaf   :  { %1536 = vmatpush1.bf16.msra.mxu1 %v2820_v32  ;;  %1500 = vmatprep.subr.bf16.mxu0 %v2831_v35  ;;  %v2913_v32 = vld [vmem:[#allocation4 + $0x30] ss:$8 sps:$4 sm:$0xff]   ;;  %v2918_v35 = vld [vmem:[#allocation4 + $0x24] ss:$8 sps:$4 sm:$0xff]  }
  0xb0   :  { %1537 = vmatprep.subr.bf16.mxu1 %v2828_v34  ;;  %v2951_v34 = vld [vmem:[#allocation4 + $0x174] ss:$8 sps:$4 sm:$0xff]  }
  0xb2   :  { %1501 = vmatpush1.bf16.msra.mxu0 %v2829_v6  ;;  %v2916_v6 = vld [vmem:[#allocation4 + $0x20] ss:$8 sps:$4 sm:$0xff]  }
  0xb3   :  { %1538 = vmatpush1.bf16.msra.mxu1 %v2826_v36  ;;  %1502 = vmatprep.subr.bf16.mxu0 %v2837_v38  ;;  %v2954_v36 = vld [vmem:[#allocation4 + $0x164] ss:$8 sps:$4 sm:$0xff]   ;;  %v2955_v38 = vld [vmem:[#allocation4 + $0x150] ss:$8 sps:$4 sm:$0xff]  }
  0xb4   :  { %1539 = vmatprep.subr.bf16.mxu1 %v2834_v37  ;;  %v2921_v37 = vld [vmem:[#allocation4 + $0x14] ss:$8 sps:$4 sm:$0xff]  }
  0xb6   :  { %1503 = vmatpush1.bf16.msra.mxu0 %v2835_v40  ;;  %v2960_v40 = vld [vmem:[#allocation4 + $0x144] ss:$8 sps:$4 sm:$0xff]  }
  0xb7   :  { %1540 = vmatpush1.bf16.msra.mxu1 %v2832_v39  ;;  %1504 = vmatprep.subr.bf16.mxu0 %v2843_v41  ;;  %v2919_v39 = vld [vmem:[#allocation4 + $0x10] ss:$8 sps:$4 sm:$0xff]   ;;  %v2958_v41 = vld [vmem:[#allocation4 + $0x140] ss:$8 sps:$4 sm:$0xff]  }
  0xb8   :  { %1541 = vmatprep.subr.bf16.mxu1 %v2840_v33  ;;  %v2924_v33 = vld [vmem:[#allocation4 + $0x4] ss:$8 sps:$4 sm:$0xff]  }
  0xba   :  { %1505 = vmatpush1.bf16.msra.mxu0 %v2841_v43  ;;  %v2927_v43 = vld [vmem:[#allocation4 + $0xf4] ss:$8 sps:$4 sm:$0xff]  }
  0xbb   :  { %1542 = vmatpush1.bf16.msra.mxu1 %v2838_v42  ;;  %1506 = vmatprep.subr.bf16.mxu0 %v2849_v45  ;;  %v2963_v42 = vld [vmem:[#allocation4 + $0x134] ss:$8 sps:$4 sm:$0xff]   ;;  %v2925_v45 = vld [vmem:[#allocation4 + $0xf0] ss:$8 sps:$4 sm:$0xff]  }
  0xbc   :  { %1543 = vmatprep.subr.bf16.mxu1 %v2846_v44  ;;  %v2961_v44 = vld [vmem:[#allocation4 + $0x130] ss:$8 sps:$4 sm:$0xff]  }
  0xbe   :  { %1507 = vmatpush2.bf16.msra.mxu0 %v2847_v47  ;;  %v2930_v47 = vld [vmem:[#allocation4 + $0xe4] ss:$8 sps:$4 sm:$0xff]  }
  0xbf   :  { %1544 = vmatpush1.bf16.msra.mxu1 %v2844_v46  ;;  %1508 = vmatprep.subr.bf16.mxu0 %v2855_v49  ;;  %v2966_v46 = vld [vmem:[#allocation4 + $0x124] ss:$8 sps:$4 sm:$0xff]   ;;  %v2928_v49 = vld [vmem:[#allocation4 + $0xe0] ss:$8 sps:$4 sm:$0xff]  }
  0xc0   :  { %1545 = vmatprep.subr.bf16.mxu1 %v2852_v48  ;;  %v2964_v48 = vld [vmem:[#allocation4 + $0x120] ss:$8 sps:$4 sm:$0xff]  }
  0xc2   :  { %1509 = vmatpush2.bf16.msra.mxu0 %v2853_v52  ;;  %v2933_v52 = vld [vmem:[#allocation4 + $0xd4] ss:$8 sps:$4 sm:$0xff]  }
  0xc3   :  { %1546 = vmatpush1.bf16.msra.mxu1 %v2850_v50  ;;  %1510 = vmatprep.subr.bf16.mxu0 %v2861_v54  ;;  %v2969_v50 = vld [vmem:[#allocation4 + $0x114] ss:$8 sps:$4 sm:$0xff]   ;;  %v2931_v54 = vld [vmem:[#allocation4 + $0xd0] ss:$8 sps:$4 sm:$0xff]  }
  0xc4   :  { %1547 = vmatprep.subr.bf16.mxu1 %v2858_v53  ;;  %v2967_v53 = vld [vmem:[#allocation4 + $0x110] ss:$8 sps:$4 sm:$0xff]  }
  0xc6   :  { %1511 = vmatpush2.bf16.msra.mxu0 %v2859_v56  ;;  %v2936_v56 = vld [vmem:[#allocation4 + $0xc4] ss:$8 sps:$4 sm:$0xff]  }
  0xc7   :  { %1548 = vmatpush2.bf16.msra.mxu1 %v2856_v55  ;;  %1512 = vmatprep.subr.bf16.mxu0 %v2867_v58  ;;  %v2972_v55 = vld [vmem:[#allocation4 + $0x104] ss:$8 sps:$4 sm:$0xff]   ;;  %v2934_v58 = vld [vmem:[#allocation4 + $0xc0] ss:$8 sps:$4 sm:$0xff]  }
  0xc8   :  { %1549 = vmatprep.subr.bf16.mxu1 %v2864_v57  ;;  %v2970_v57 = vld [vmem:[#allocation4 + $0x100] ss:$8 sps:$4 sm:$0xff]  }
  0xca   :  { %1513 = vmatpush2.bf16.msra.mxu0 %v2865_v60  ;;  %v2939_v60 = vld [vmem:[#allocation4 + $0xb4] ss:$8 sps:$4 sm:$0xff]  }
  0xcb   :  { %1550 = vmatpush2.bf16.msra.mxu1 %v2862_v59  ;;  %1514 = vmatprep.subr.bf16.mxu0 %v2873_v62  ;;  %v2975_v59 = vld [vmem:[#allocation4 + $0x1f4] ss:$8 sps:$4 sm:$0xff]   ;;  %v2937_v62 = vld [vmem:[#allocation4 + $0xb0] ss:$8 sps:$4 sm:$0xff]  }
  0xcc   :  { %1551 = vmatprep.subr.bf16.mxu1 %v2870_v61  ;;  %v2973_v61 = vld [vmem:[#allocation4 + $0x1f0] ss:$8 sps:$4 sm:$0xff]  }
  0xce   :  { %1515 = vmatpush2.bf16.msra.mxu0 %v2871_v0  ;;  %v2942_v0 = vld [vmem:[#allocation4 + $0xa4] ss:$8 sps:$4 sm:$0xff]  }
  0xcf   :  { %1552 = vmatpush2.bf16.msra.mxu1 %v2868_v63  ;;  %1516 = vmatprep.subr.bf16.mxu0 %v2879_v2  ;;  %v2978_v63 = vld [vmem:[#allocation4 + $0x1e4] ss:$8 sps:$4 sm:$0xff]   ;;  %v2940_v2 = vld [vmem:[#allocation4 + $0xa0] ss:$8 sps:$4 sm:$0xff]  }
  0xd0   :  { %1553 = vmatprep.subr.bf16.mxu1 %v2876_v1  ;;  %v2976_v1 = vld [vmem:[#allocation4 + $0x1e0] ss:$8 sps:$4 sm:$0xff]  }
  0xd2   :  { %1517 = vmatpush2.bf16.msra.mxu0 %v2877_v4  ;;  %v2943_v4 = vld [vmem:[#allocation4 + $0x90] ss:$8 sps:$4 sm:$0xff]  }
  0xd3   :  { %1554 = vmatpush2.bf16.msra.mxu1 %v2874_v3  ;;  %1518 = vmatprep.subr.bf16.mxu0 %v2885_v8  ;;  %v2945_v3 = vld [vmem:[#allocation4 + $0x94] ss:$8 sps:$4 sm:$0xff]   ;;  %v2946_v8 = vld [vmem:[#allocation4 + $0x80] ss:$8 sps:$4 sm:$0xff]  }
  0xd4   :  { %1555 = vmatprep.subr.bf16.mxu1 %v2882_v5  ;;  %v2948_v5 = vld [vmem:[#allocation4 + $0x84] ss:$8 sps:$4 sm:$0xff]  }
  0xd6   :  { %1519 = vmatpush2.bf16.msra.mxu0 %v2883_v10 }
  0xd7   :  { %1556 = vmatpush2.bf16.msra.mxu1 %v2880_v9  ;;  %1520 = vmatprep.subr.bf16.mxu0 %v2891_v12  ;;  %v2979_v12 = vld [vmem:[#allocation4 + $0x1d0] ss:$8 sps:$4 sm:$0xff]  }
  0xd8   :  { %1557 = vmatprep.subr.bf16.mxu1 %v2888_v11  ;;  %v2981_v11 = vld [vmem:[#allocation4 + $0x1d4] ss:$8 sps:$4 sm:$0xff]  }
  0xda   :  { %1521 = vmatpush2.bf16.msra.mxu0 %v2889_v16 }
  0xdb   :  { %1558 = vmatpush2.bf16.msra.mxu1 %v2886_v15  ;;  %2017 = vmatprep.subr.bf16.mxu0 %v2903_v19  ;;  %v2984_v19 = vld [vmem:[#allocation4 + $0x1c4] ss:$8 sps:$4 sm:$0xff]  }
  0xdc   :  { %1559 = vmatprep.subr.bf16.mxu1 %v2894_v18  ;;  %v2982_v18 = vld [vmem:[#allocation4 + $0x1c0] ss:$8 sps:$4 sm:$0xff]  }
  0xdd   :  { %1523 = vmatmul.mubr.bf16.vlgmr.msra.gmra.mxu0 %v3124_v7  ;;  %v2910_v7 = vld [vmem:[#allocation4 + $0x40] ss:$8 sps:$4 sm:$0xff]  }
  0xde   :  { %2018 = vmatpush1.bf16.msra.mxu0 %v2901_v21 }
  0xdf   :  { %1560 = vmatpush2.bf16.msra.mxu1 %v2892_v20  ;;  %2019 = vmatprep.subr.bf16.mxu0 %v2906_v23 }
  0xe0   :  { %1561 = vmatprep.subr.bf16.mxu1 %v2897_v22 }
  0xe2   :  { %2020 = vmatpush1.bf16.msra.mxu0 %v2904_v25  ;;  %v2987_v25 = vld [vmem:[#allocation4 + $0x1b4] ss:$8 sps:$4 sm:$0xff]  }
  0xe3   :  { %1562 = vmatpush2.bf16.msra.mxu1 %v2895_v24  ;;  %2021 = vmatprep.subr.bf16.mxu0 %v2909_v27 }
  0xe4   :  { %1586 = vmatprep.subr.bf16.mxu1 %v2900_v26  ;;  %v2985_v26 = vld [vmem:[#allocation4 + $0x1b0] ss:$8 sps:$4 sm:$0xff]  }
  0xe6   :  { %1564 = vmatmul.mubr.bf16.vlgmr.msra.gmra.mxu1 %v3149_v14  ;;  %2022 = vmatpush1.bf16.msra.mxu0 %v2907_v29  ;;  %v2952_v14 = vld [vmem:[#allocation4 + $0x160] ss:$8 sps:$4 sm:$0xff]   ;;  %v2990_v29 = vld [vmem:[#allocation4 + $0x1a4] ss:$8 sps:$4 sm:$0xff]  }
  0xe7   :  { %1587 = vmatpush1.bf16.msra.mxu1 %v2898_v28  ;;  %1604 = vmatprep.mubr.bf16.mxu1 %v3063_v13  ;;  %v2957_v13 = vld [vmem:[#allocation4 + $0x154] ss:$8 sps:$4 sm:$0xff]  }
  0xe8   :  { %2023 = vmatprep.subr.bf16.mxu0 %v2912_v30  ;;  %2058 = vmatprep.subr.bf16.mxu1 %v2951_v34  ;;  %v2988_v30 = vld [vmem:[#allocation4 + $0x1a0] ss:$8 sps:$4 sm:$0xff]  }
  0xe9   :  { %v2994_v34 = vld [vmem:[#allocation4 + $0x180] ss:$8 sps:$4 sm:$0xff]  }
  0xea   :  { %2024 = vmatpush1.bf16.msra.mxu0 %v2910_v7 }
  0xeb   :  { %2025 = vmatprep.subr.bf16.mxu0 %v2915_v31  ;;  %v2993_v31 = vld [vmem:[#allocation4 + $0x194] ss:$8 sps:$4 sm:$0xff]  }
  0xee   :  { %2489 = vmatmul.mubr.msk.bf16.vlgmr.msra.gmra.mxu1 %vm1281_vm0, %v3132_v17  ;;  %2026 = vmatpush1.bf16.msra.mxu0 %v2913_v32  ;;  %v2922_v17 = vld [vmem:[#allocation4] ss:$8 sps:$4 sm:$0xff]   ;;  %v2991_v32 = vld [vmem:[#allocation4 + $0x190] ss:$8 sps:$4 sm:$0xff]  }
  0xef   :  { %2059 = vmatpush1.bf16.msra.mxu1 %v2949_v51  ;;  %2027 = vmatprep.subr.bf16.mxu0 %v2918_v35  ;;  %v2996_v51 = vld [vmem:[#allocation4 + $0x184] ss:$8 sps:$4 sm:$0xff]   ;;  %v257_v35 = vlaneseq }
  0xf0   :  { %2060 = vmatprep.subr.bf16.mxu1 %v2954_v36 }
  0xf1   :  { %v3160_v36 = vshrl.u32 %v257_v35, 7  ;;  %v3006_v35 = vld [vmem:[%s3239_s5 + $0x18] sm:$0xff]  }
  0xf2   :  { %2028 = vmatpush1.bf16.msra.mxu0 %v2916_v6  ;;  %v255_v6 = vld [vmem:[%s3236_s2] sm:$0xf] }
  0xf3   :  { %2061 = vmatpush1.bf16.msra.mxu1 %v2952_v14  ;;  %2029 = vmatprep.subr.bf16.mxu0 %v2921_v37  ;;  %v259_v14 = vsub.s32 0, %v3160_v36 }
  0xf4   :  { %2062 = vmatprep.subr.bf16.mxu1 %v2957_v13  ;;  %v263_v13 = vsub.s32 1, %v3160_v36 }
  0xf5   :  { %v260_v37 = vrot.slane %v255_v6, %v259_v14 }
  0xf6   :  { %2030 = vmatpush1.bf16.msra.mxu0 %v2919_v39 }
  0xf7   :  { %2063 = vmatpush1.bf16.msra.mxu1 %v2955_v38  ;;  %2031 = vmatprep.subr.bf16.mxu0 %v2924_v33  ;;  %v264_v38 = vrot.slane %v255_v6, %v263_v13 }
  0xf8   :  { %2064 = vmatprep.subr.bf16.mxu1 %v2960_v40 }
  0xfa   :  { %2032 = vmatpush1.bf16.msra.mxu0 %v2922_v17 }
  0xfb   :  { %2065 = vmatpush1.bf16.msra.mxu1 %v2958_v41  ;;  %2033 = vmatprep.subr.bf16.mxu0 %v2927_v43 }
  0xfc   :  { %2066 = vmatprep.subr.bf16.mxu1 %v2963_v42 }
  0xfe   :  { %2034 = vmatpush2.bf16.msra.mxu0 %v2925_v45 }
  0xff   :  { %2067 = vmatpush1.bf16.msra.mxu1 %v2961_v44  ;;  %2035 = vmatprep.subr.bf16.mxu0 %v2930_v47 }
 0x100   :  { %2068 = vmatprep.subr.bf16.mxu1 %v2966_v46 }
 0x102   :  { %2036 = vmatpush2.bf16.msra.mxu0 %v2928_v49 }
 0x103   :  { %2069 = vmatpush1.bf16.msra.mxu1 %v2964_v48  ;;  %2037 = vmatprep.subr.bf16.mxu0 %v2933_v52 }
 0x104   :  { %2070 = vmatprep.subr.bf16.mxu1 %v2969_v50 }
 0x106   :  { %2038 = vmatpush2.bf16.msra.mxu0 %v2931_v54 }
 0x107   :  { %2071 = vmatpush1.bf16.msra.mxu1 %v2967_v53  ;;  %2039 = vmatprep.subr.bf16.mxu0 %v2936_v56 }
 0x108   :  { %2072 = vmatprep.subr.bf16.mxu1 %v2972_v55 }
 0x10a   :  { %2040 = vmatpush2.bf16.msra.mxu0 %v2934_v58 }
 0x10b   :  { %2073 = vmatpush1.bf16.msra.mxu1 %v2970_v57  ;;  %2041 = vmatprep.subr.bf16.mxu0 %v2939_v60  ;;  %v267_v60 = vsub.s32 2, %v3160_v36 }
 0x10c   :  { %2074 = vmatprep.subr.bf16.mxu1 %v2975_v59 }
 0x10e   :  { %2042 = vmatpush2.bf16.msra.mxu0 %v2937_v62  ;;  %v271_v62 = vsub.s32 3, %v3160_v36  ;;  %v2554_v36 = vld [vmem:[%s3240_s6] ss:$0 sm:$0xff] }
 0x10f   :  { %2075 = vmatpush2.bf16.msra.mxu1 %v2973_v61  ;;  %2043 = vmatprep.subr.bf16.mxu0 %v2942_v0  ;;  %v268_v0 = vrot.slane %v255_v6, %v267_v60 }
 0x110   :  { %2076 = vmatprep.subr.bf16.mxu1 %v2978_v63 }
 0x112   :  { %2044 = vmatpush2.bf16.msra.mxu0 %v2940_v2  ;;  %v272_v2 = vrot.slane %v255_v6, %v271_v62  ;;  %v3007_v6 = vld [vmem:[%s3239_s5 + $0x50] sm:$0xff]  }
 0x113   :  { %2077 = vmatpush2.bf16.msra.mxu1 %v2976_v1  ;;  %2045 = vmatprep.subr.bf16.mxu0 %v2945_v3 }
 0x114   :  { %2078 = vmatprep.subr.bf16.mxu1 %v2981_v11 }
 0x116   :  { %2046 = vmatpush2.bf16.msra.mxu0 %v2943_v4 }
 0x117   :  { %2047 = vmatprep.subr.bf16.mxu0 %v2948_v5  ;;  %2079 = vmatpush2.bf16.msra.mxu1 %v2979_v12 }
 0x118   :  { %2080 = vmatprep.subr.bf16.mxu1 %v2984_v19 }
 0x11a   :  { %2048 = vmatpush2.bf16.msra.mxu0 %v2946_v8 }
 0x11b   :  { %2081 = vmatpush2.bf16.msra.mxu1 %v2982_v18 }
 0x11c   :  { %2082 = vmatprep.subr.bf16.mxu1 %v2987_v25 }
 0x11d   :  { %v1319_v9 = vpop.f32.mrf.mxu0 }
 0x11e   :  { %v1360_v10 = vpop.f32.mrf.mxu1  ;;  %v1320_v39 = vadd.f32 %v1319_v9, %v260_v37  ;;  %v3008_v37 = vld [vmem:[%s3239_s5 + $0x10] sm:$0xff]  }
 0x11f   :  { %v1321_v15 = vpop.f32.mrf.mxu0  ;;  %2083 = vmatpush2.bf16.msra.mxu1 %v2985_v26 }
 0x120   :  { %v1362_v16 = vpop.f32.mrf.mxu1  ;;  %2084 = vmatprep.subr.bf16.mxu1 %v2990_v29  ;;  %v1322_v40 = vadd.f32 %v1321_v15, %v264_v38  ;;  %v1361_v33 = vadd.f32 %v1360_v10, %v1320_v39  ;;  %v3001_v29 = vld [vmem:[%s3239_s5 + $0x68] sm:$0xff]  }
 0x121   :  { %v1323_v21 = vpop.f32.mrf.mxu0  ;;  %v3009_v38 = vld [vmem:[%s3239_s5 + $0x48] sm:$0xff]  }
 0x122   :  { %v1364_v20 = vpop.f32.mrf.mxu1  ;;  %v1363_v17 = vadd.f32 %v1362_v16, %v1322_v40  ;;  %v2998_v21 = vld [vmem:[%s3239_s5 + $0x38] sm:$0xff]   ;;  %v3010_v39 = vld [vmem:[%s3239_s5 + $0x8] sm:$0xff]   ;;  %v3011_v40 = vld [vmem:[%s3239_s5 + $0x40] sm:$0xff]  }
 0x123   :  { %v1324_v23 = vpop.f32.mrf.mxu0  ;;  %2085 = vmatpush2.bf16.msra.mxu1 %v2988_v30  ;;  %v2997_v20 = vld [vmem:[%s3239_s5 + $0x78] sm:$0xff]  }
 0x124   :  { %v1365_v22 = vpop.f32.mrf.mxu1  ;;  %2086 = vmatprep.subr.bf16.mxu1 %v2993_v31  ;;  %2571 = vmatprep.subr.bf16.mxu0 %v2997_v20  ;;  %v3002_v31 = vld [vmem:[%s3239_s5 + $0x28] sm:$0xff]  }
 0x125   :  { %v2999_v22 = vld [vmem:[%s3239_s5 + $0x70] sm:$0xff]  }
 0x126   :  { %v1442_v24 = vpop.f32.mrf.mxu1 }
 0x127   :  { %2087 = vmatpush2.bf16.msra.mxu1 %v2991_v32  ;;  %v3003_v32 = vld [vmem:[%s3239_s5 + $0x60] sm:$0xff]  }
 0x128   :  { %v1444_v27 = vpop.f32.mrf.mxu1  ;;  %2088 = vmatprep.subr.bf16.mxu1 %v2996_v51  ;;  %v3004_v51 = vld [vmem:[%s3239_s5 + $0x20] sm:$0xff]  }
 0x12a   :  { %v1446_v28 = vpop.f32.mrf.mxu1 }
 0x12b   :  { %2089 = vmatpush2.bf16.msra.mxu1 %v2994_v34  ;;  %v3005_v34 = vld [vmem:[%s3239_s5 + $0x58] sm:$0xff]  }
 0x12c   :  { %v1447_v7 = vpop.f32.mrf.mxu1 }
 0x15d   :  { %v1401_v41 = vpop.f32.mrf.mxu0 }
 0x15e   :  { %v1402_v42 = vadd.f32 %v1401_v41, %v1361_v33  ;;  %v3012_v33 = vld [vmem:[%s3239_s5] sm:$0xff]  }
 0x15f   :  { %v1403_v43 = vpop.f32.mrf.mxu0 }
 0x160   :  { %v1443_v44 = vadd.f32 %v1442_v24, %v1402_v42  ;;  %v1404_v45 = vadd.f32 %v1403_v43, %v1363_v17 }
 0x161   :  { %v1405_v46 = vpop.f32.mrf.mxu0 }
 0x162   :  { %v1445_v47 = vadd.f32 %v1444_v27, %v1404_v45  ;;  %v1613_v48 = vmax.f32 %v1443_v44, 0.0  ;;  %v3000_v27 = vld [vmem:[%s3239_s5 + $0x30] sm:$0xff]   ;;  %v1685_v44 = vld [vmem:[%s3238_s4] sm:$0x3] }
 0x163   :  { %v1406_v49 = vpop.f32.mrf.mxu0  ;;  %v1690_v45 = vrot.slane %v1685_v44, %v259_v14  ;;  %v1694_v46 = vrot.slane %v1685_v44, %v263_v13 }
 0x164   :  { %v1614_v50 = vmax.f32 %v1445_v47, 0.0  ;;  %v1617_v54 = vpack.c.bf16 %v1613_v48, %v1613_v48 }
 0x166   :  { %v1483_v52 = vpop.f32.mrf.mxu1  ;;  %v1618_v53 = vpack.c.bf16 %v1614_v50, %v1614_v50 }
 0x167   :  { %v1484_v4 = vadd.f32 %v1483_v52, %v268_v0 }
 0x168   :  { %v1485_v55 = vpop.f32.mrf.mxu1  ;;  %2049 = vmatprep.mubr.bf16.mxu0 %v1618_v53 }
 0x169   :  { %2050 = vmatmul.mubr.bf16.vlgmr.msra.gmra.mxu0 %v1617_v54  ;;  %v1486_v8 = vadd.f32 %v1485_v55, %v272_v2 }
 0x16a   :  { %v1487_v56 = vpop.f32.mrf.mxu1  ;;  %2572 = vmatpush3.bf16.msra.mxu0 %v2998_v21 }
 0x16b   :  { %2573 = vmatprep.subr.bf16.mxu0 %v2999_v22 }
 0x16c   :  { %v1488_v57 = vpop.f32.mrf.mxu1 }
 0x16e   :  { %2574 = vmatpush3.bf16.msra.mxu0 %v3000_v27 }
 0x16f   :  { %2575 = vmatprep.subr.bf16.mxu0 %v3001_v29 }
 0x172   :  { %2576 = vmatpush3.bf16.msra.mxu0 %v3002_v31 }
 0x173   :  { %2577 = vmatprep.subr.bf16.mxu0 %v3003_v32 }
 0x176   :  { %2578 = vmatpush3.bf16.msra.mxu0 %v3004_v51 }
 0x177   :  { %2579 = vmatprep.subr.bf16.mxu0 %v3005_v34 }
 0x17a   :  { %2580 = vmatpush3.bf16.msra.mxu0 %v3006_v35 }
 0x17b   :  { %2581 = vmatprep.subr.bf16.mxu0 %v3007_v6 }
 0x17e   :  { %2582 = vmatpush3.bf16.msra.mxu0 %v3008_v37 }
 0x17f   :  { %2583 = vmatprep.subr.bf16.mxu0 %v3009_v38 }
 0x182   :  { %2584 = vmatpush3.bf16.msra.mxu0 %v3010_v39 }
 0x183   :  { %2585 = vmatprep.subr.bf16.mxu0 %v3011_v40 }
 0x186   :  { %2586 = vmatpush3.bf16.msra.mxu0 %v3012_v33 }
 0x19d   :  { %v1524_v58 = vpop.f32.mrf.mxu0 }
 0x19e   :  { %v1525_v9 = vadd.f32 %v1524_v58, %v1484_v4 }
 0x19f   :  { %v1526_v59 = vpop.f32.mrf.mxu0 }
 0x1a0   :  { %v1527_v11 = vadd.f32 %v1526_v59, %v1486_v8 }
 0x1a1   :  { %v1528_v61 = vpop.f32.mrf.mxu0 }
 0x1a3   :  { %v1529_v63 = vpop.f32.mrf.mxu0 }
 0x1a6   :  { %v1565_v1 = vpop.f32.mrf.mxu1 }
 0x1a7   :  { %v1566_v12 = vadd.f32 %v1565_v1, %v1525_v9 }
 0x1a8   :  { %v1567_v3 = vpop.f32.mrf.mxu1 }
 0x1a9   :  { %v1568_v16 = vadd.f32 %v1567_v3, %v1527_v11 }
 0x1aa   :  { %v1569_v5 = vpop.f32.mrf.mxu1 }
 0x1ac   :  { %v1570_v10 = vpop.f32.mrf.mxu1 }
 0x1ae   :  { %v1606_v15 = vpop.f32.mrf.mxu1 }
 0x1af   :  { %v1607_v18 = vadd.f32 %v1606_v15, %v1566_v12 }
 0x1b0   :  { %v1608_v19 = vpop.f32.mrf.mxu1 }
 0x1b1   :  { %v1609_v23 = vadd.f32 %v1608_v19, %v1568_v16  ;;  %v1615_v24 = vmax.f32 %v1607_v18, 0.0 }
 0x1b2   :  { %v1610_v25 = vpop.f32.mrf.mxu1 }
 0x1b3   :  { %v1616_v26 = vmax.f32 %v1609_v23, 0.0  ;;  %v1619_v7 = vpack.c.bf16 %v1615_v24, %v1615_v24 }
 0x1b4   :  { %v1611_v28 = vpop.f32.mrf.mxu1 }
 0x1b5   :  { %v1620_v30 = vpack.c.bf16 %v1616_v26, %v1616_v26 }
 0x1b7   :  { %2090 = vmatprep.mubr.bf16.mxu1 %v1620_v30 }
 0x1b8   :  { %2091 = vmatmul.mubr.bf16.vlgmr.msra.gmra.mxu1 %v1619_v7 }
 0x229   :  { %v2051_v41 = vpop.f32.mrf.mxu0 }
 0x22a   :  { %v2052_v47 = vadd.f32 %v2051_v41, %v1690_v45 }
 0x22b   :  { %v2053_v17 = vpop.f32.mrf.mxu0 }
 0x22c   :  { %v2054_v49 = vadd.f32 %v2053_v17, %v1694_v46 }
 0x22d   :  { %v2055_v42 = vpop.f32.mrf.mxu0 }
 0x22f   :  { %v2056_v43 = vpop.f32.mrf.mxu0 }
 0x278   :  { %v2092_v48 = vpop.f32.mrf.mxu1 }
 0x279   :  { %v2093_v50 = vadd.f32 %v2092_v48, %v2052_v47 }
 0x27a   :  { %v2094_v52 = vpop.f32.mrf.mxu1 }
 0x27b   :  { %v2095_v53 = vadd.f32 %v2094_v52, %v2054_v49  ;;  %v2099_v54 = vmax.f32 %v2093_v50, 0.0 }
 0x27c   :  { %v2096_v55 = vpop.f32.mrf.mxu1 }
 0x27d   :  { %v2100_v56 = vmax.f32 %v2095_v53, 0.0  ;;  %v2101_v59 = vpack.c.bf16 %v2099_v54, %v2099_v54 }
 0x27e   :  { %v2097_v57 = vpop.f32.mrf.mxu1 }
 0x27f   :  { %v2102_v58 = vpack.c.bf16 %v2100_v56, %v2100_v56 }
 0x281   :  { %2270 = vmatprep.mubr.bf16.mxu0 %v2102_v58 }
 0x282   :  { %2271 = vmatmul.mubr.bf16.vlgmr.msra.gmra.mxu0 %v2101_v59 }
 0x342   :  { %v2587_v60 = vpop.f32.mrf.mxu0 }
 0x344   :  { %v2588_v14 = vpop.f32.mrf.mxu0 }
 0x345   :  { %v2589_v13 = vadd.f32 %v2588_v14, %v2587_v60 }
 0x346   :  { %v2590_v61 = vpop.f32.mrf.mxu0 }
 0x347   :  { %v2273_v62 = vadd.f32 %v2589_v13, %v2554_v36 }
 0x348   :  { %v2591_v63 = vpop.f32.mrf.mxu0 }
 0x349   :  { %2278 = vst [vmem:[%s3241_s7] sm:$0xff] %v2273_v62 }
 0x34a   :  { %2283 = vsyncpa [#allocation3], 1 }
 0x34b   :  { %2284 = vsyncpa [#allocation5], 1 }

</bundles_post_ra>
